<compile_context>
chip_gen: v7x
topology: tpu7x:2x2x1
jax: 0.10.0
libtpu: 0.0.40
codegen_flags: <defaults>
</compile_context>

<pallas_src>
import functools

import jax
import jax.numpy as jnp
from jax import lax
from jax.experimental import pallas as pl
from jax.experimental.pallas import tpu as pltpu


def _round_up(x, m):
    return ((x + m - 1) // m) * m


def _cdiv(a, b):
    return (a + b - 1) // b


def _classifier_head_kernel(h_ref, w_ref, b_ref, o_ref, acc_ref, *,
                            training: bool, keep_prob: float, seed: int,
                            inv_seq_len: float, seq_tail: int):
    """One grid step: (batch tile b, seq tile k).

    h_ref:   [TB, TS, H]  hidden-state tile (native dtype; edge tiles partial)
    w_ref:   [H, Lp]      linear weight (transposed + lane-padded, resident)
    b_ref:   [1, Lp]      linear bias (lane-padded, resident)
    o_ref:   [TB, Lp]     output logits tile (f32)
    acc_ref: [TB, H]      f32 running sum over the sequence dimension
    """
    k = pl.program_id(1)
    n_seq = pl.num_programs(1)

    @pl.when(k == 0)
    def _():
        acc_ref[...] = jnp.zeros_like(acc_ref)

    if seq_tail:
        # Last seq tile is partial: mask garbage rows (static mask, only on
        # the final step so the common streaming path stays vld + vadd).
        is_last_seq = k == n_seq - 1

        @pl.when(jnp.logical_not(is_last_seq))
        def _():
            acc_ref[...] += jnp.sum(h_ref[...].astype(jnp.float32), axis=1)

        @pl.when(is_last_seq)
        def _():
            h = h_ref[...].astype(jnp.float32)
            sidx = lax.broadcasted_iota(jnp.int32, h.shape, 1)
            h = jnp.where(sidx < seq_tail, h, 0.0)
            acc_ref[...] += jnp.sum(h, axis=1)
    else:
        acc_ref[...] += jnp.sum(h_ref[...].astype(jnp.float32), axis=1)

    @pl.when(k == n_seq - 1)
    def _():
        # torch.mean(hidden_state, dim=1) — divide by the true sequence length.
        pooled = acc_ref[...] * inv_seq_len                       # [TB, H] f32

        # nn.Dropout(0.3): identity in eval; inverted dropout in train.
        if training:
            pltpu.prng_seed(seed + pl.program_id(0))
            bits = pltpu.bitcast(pltpu.prng_random_bits(pooled.shape),
                                 jnp.uint32)
            u = (bits >> 8).astype(jnp.float32) * (1.0 / (1 << 24))  # U[0,1)
            pooled = jnp.where(u < keep_prob,
                               pooled * (1.0 / keep_prob),
                               0.0)

        # nn.Linear: pooled @ W^T + b (weight already transposed to [H, Lp]).
        # Use the weight's native dtype on the MXU (bf16 weight -> bf16 matmul
        # with f32 accumulation; f32 weight -> exact f32 path).
        w = w_ref[...]
        logits = jnp.dot(pooled.astype(w.dtype), w,
                         preferred_element_type=jnp.float32)
        o_ref[...] = (logits + b_ref[...].astype(jnp.float32)).astype(o_ref.dtype)


def _vmem_budgets():
    """(per_input_buffer_bytes, total_tile_budget_bytes, vmem_limit_cap_bytes)
    chosen per chip generation (128 MiB VMEM on v5e/v6e, 64 MiB on v7x)."""
    phys = 64 << 20                       # conservative fallback (v7x-sized)
    try:
        phys = int(pltpu.get_tpu_info().vmem_capacity_bytes)
    except Exception:
        pass
    if phys >= (100 << 20):               # v5e / v6e: 128 MiB physical VMEM
        return 14 << 20, 96 << 20, 112 << 20
    return 6 << 20, 38 << 20, 48 << 20    # v7x: 64 MiB physical VMEM


def _choose_tiles(B, S, H, h_itemsize, w_bytes, Lp, per_buffer, total_budget):
    """Pick (TB, TS) so the hidden tile is a large, DMA-friendly HBM stream
    while the whole working set (double-buffered hidden tile, resident weight,
    accumulator, output) stays inside the per-chip VMEM budget."""
    sub = max(8, 32 // h_itemsize)        # sublane multiple: f32 8, bf16 16, i8 32
    TB = min(128, _round_up(max(B, 1), 8))
    # Give the 'parallel' batch axis >= 2 steps so both v7x TensorCores get work.
    if _cdiv(B, TB) == 1 and B >= 16:
        TB = _round_up(_cdiv(B, 2), 8)
    S_cap = _round_up(S, sub)
    while True:
        fixed = (w_bytes                  # resident (single-buffered) weight
                 + 2 * Lp * 4             # bias
                 + 2 * TB * Lp * 4        # output tile (double-buffered)
                 + TB * H * 4)            # f32 accumulator
        avail = min(2 * per_buffer, total_budget - fixed)
        ts = avail // max(1, 2 * TB * H * h_itemsize)
        ts = (ts // sub) * sub
        if ts >= sub or TB <= 8:
            TS = max(sub, min(S_cap, ts))
            return TB, TS
        TB = max(8, TB // 2)              # shrink TB before giving up on TS


def _classifier_head_reference(hidden_state, weight, bias):
    pooled = jnp.mean(hidden_state.astype(jnp.float32), axis=1)
    return pooled @ weight.T.astype(jnp.float32) + bias.astype(jnp.float32)


def classifier_head(hidden_state, weight, bias, *, training=False,
                    keep_prob=0.7, seed=0, use_pallas=None, _force_tiles=None):
    """hidden_state: [B, S, H] (f32 or bf16); weight: [L, H] (PyTorch layout);
    bias: [L].  Returns logits [B, L] in f32."""
    B, S, H = hidden_state.shape
    L = weight.shape[0]

    # Tiny inputs: pallas_call fixed overhead dominates; let XLA fuse it.
    if use_pallas is None:
        use_pallas = hidden_state.size >= (1 << 18)
    if not use_pallas and not training:
        return _classifier_head_reference(hidden_state, weight, bias)

    h_itemsize = jnp.dtype(hidden_state.dtype).itemsize
    w_itemsize = jnp.dtype(weight.dtype).itemsize
    Lp = _round_up(max(L, 1), 128)                       # lane-dense output width
    w_bytes = H * Lp * w_itemsize

    per_buffer, total_budget, limit_cap = _vmem_budgets()
    if _force_tiles is not None:
        TB, TS = _force_tiles
    else:
        TB, TS = _choose_tiles(B, S, H, h_itemsize, w_bytes, Lp,
                               per_buffer, total_budget)

    nb = _cdiv(B, TB)
    nk = _cdiv(S, TS)
    seq_tail = S - (nk - 1) * TS
    if seq_tail == TS:
        seq_tail = 0                                     # last seq tile is full

    # Only the tiny weight / bias are padded; the full hidden state is streamed
    # unpadded (partial edge tiles are masked in-kernel / sliced off).
    w_t = weight.T                                       # [H, L]
    b2 = bias.reshape(1, L)
    if Lp != L:
        w_t = jnp.pad(w_t, ((0, 0), (0, Lp - L)))        # [H, Lp]
        b2 = jnp.pad(b2, ((0, 0), (0, Lp - L)))          # [1, Lp]

    kernel = functools.partial(_classifier_head_kernel,
                               training=training, keep_prob=keep_prob,
                               seed=seed, inv_seq_len=1.0 / S,
                               seq_tail=int(seq_tail))

    # VMEM need feeds back into the limit (tile chooser already respects it).
    need = (2 * TB * TS * H * h_itemsize + w_bytes + 2 * Lp * 4
            + 2 * TB * Lp * 4 + TB * H * 4)
    vmem_limit = int(min(max(need + (8 << 20), 32 << 20), limit_cap))

    def _build_and_run(single_buffer_consts):
        if single_buffer_consts:
            # Grid-invariant operands: a second pipeline buffer is pure waste.
            w_spec = pl.BlockSpec((H, Lp), lambda b, k: (0, 0),
                                  pipeline_mode=pl.Buffered(1))
            b_spec = pl.BlockSpec((1, Lp), lambda b, k: (0, 0),
                                  pipeline_mode=pl.Buffered(1))
        else:
            w_spec = pl.BlockSpec((H, Lp), lambda b, k: (0, 0))
            b_spec = pl.BlockSpec((1, Lp), lambda b, k: (0, 0))
        return pl.pallas_call(
            kernel,
            out_shape=jax.ShapeDtypeStruct((nb * TB, Lp), jnp.float32),
            grid_spec=pltpu.PrefetchScalarGridSpec(
                num_scalar_prefetch=0,
                grid=(nb, nk),
                in_specs=[
                    pl.BlockSpec((TB, TS, H), lambda b, k: (b, k, 0)),  # hidden
                    w_spec,                                             # weight
                    b_spec,                                             # bias
                ],
                out_specs=pl.BlockSpec((TB, Lp), lambda b, k: (b, 0)),
                scratch_shapes=[pltpu.VMEM((TB, H), jnp.float32)],
            ),
            compiler_params=pltpu.CompilerParams(
                dimension_semantics=("parallel", "arbitrary"),
                vmem_limit_bytes=vmem_limit),
        )(hidden_state, w_t, b2)

    try:
        out = _build_and_run(True)
    except Exception:
        # Fallback for JAX versions without BlockSpec pipeline_mode support.
        out = _build_and_run(False)

    return out[:B, :L]


if __name__ == "__main__":
    key = jax.random.PRNGKey(0)

    def _run_case(B, S, H, L, force_tiles=None):
        k_h, k_w, k_b = jax.random.split(jax.random.fold_in(key, B * 1000 + S), 3)
        hidden_state = jax.random.normal(k_h, (B, S, H), dtype=jnp.float32)
        weight = jax.random.normal(k_w, (L, H), dtype=jnp.float32) * 0.02
        bias = jax.random.normal(k_b, (L,), dtype=jnp.float32) * 0.02

        logits = classifier_head(hidden_state, weight, bias, training=False,
                                 use_pallas=True, _force_tiles=force_tiles)
        logits = jax.block_until_ready(logits)
        logits_ref = _classifier_head_reference(hidden_state, weight, bias)
        assert logits.shape == (B, L)
        assert jnp.allclose(logits, logits_ref, atol=1e-5, rtol=1e-5)

    # Small, deterministic synthetic shapes consistent with the forward pass
    # (synthetic "last hidden state" stands in for outputs.hidden_states[-1]).
    _run_case(2, 8, 32, 4)                       # aligned seq, partial batch tile
    _run_case(10, 13, 32, 4)                     # unaligned batch + seq tail mask
    _run_case(4, 30, 32, 4, force_tiles=(8, 8))  # multi-step seq reduction + tail

    print("KERNEL_OK")
</pallas_src>

<mosaic_0001>
module attributes {stable_mosaic.version = 11 : i64} {
  func.func @_classifier_head_kernel(%arg0: i32, %arg1: i32, %arg2: memref<8x8x32xf32, #tpu.memory_space<vmem>>, %arg3: memref<32x128xf32, #tpu.memory_space<vmem>>, %arg4: memref<1x128xf32, #tpu.memory_space<vmem>>, %arg5: memref<8x128xf32, #tpu.memory_space<vmem>>, %arg6: memref<8x32xf32, #tpu.memory_space<vmem>>) attributes {dimension_semantics = [#tpu.dimension_semantics<parallel>, #tpu.dimension_semantics<arbitrary>], iteration_bounds = array<i64: 1, 1>, scalar_prefetch = 0 : i64, scratch_operands = 1 : i64, tpu.core_type = #tpu.core_type<tc>, window_params = [{transform_indices = @transform_0, window_bounds = array<i64: 8, 8, 32>}, {pipeline_mode = #tpu.pipeline_mode<synchronous>, transform_indices = @transform_1, window_bounds = array<i64: 32, 128>}, {pipeline_mode = #tpu.pipeline_mode<synchronous>, transform_indices = @transform_2, window_bounds = array<i64: 1, 128>}, {transform_indices = @transform_3, window_bounds = array<i64: 8, 128>}]} {
    %c0_i32 = arith.constant 0 : i32
    %0 = arith.cmpi eq, %arg1, %c0_i32 : i32
    %1 = arith.extui %0 : i1 to i32
    %c0_i32_0 = arith.constant 0 : i32
    %2 = arith.cmpi ne, %1, %c0_i32_0 : i32
    scf.if %2 {
      %cst_9 = arith.constant 0.000000e+00 : f32
      %11 = vector.broadcast %cst_9 : f32 to vector<8x32xf32>
      %c0_10 = arith.constant 0 : index
      %c0_11 = arith.constant 0 : index
      %12 = vector.load %arg6[%c0_10, %c0_11] : memref<8x32xf32, #tpu.memory_space<vmem>>, vector<8x32xf32>
      tpu.vector_store %arg6[%c0_10, %c0_11], %11 {strides = array<i32>} : memref<8x32xf32, #tpu.memory_space<vmem>>, vector<8x32xf32>,
    } else {
    }
    %c0 = arith.constant 0 : index
    %c0_1 = arith.constant 0 : index
    %3 = vector.load %arg6[%c0, %c0_1] : memref<8x32xf32, #tpu.memory_space<vmem>>, vector<8x32xf32>
    %c0_2 = arith.constant 0 : index
    %c0_3 = arith.constant 0 : index
    %c0_4 = arith.constant 0 : index
    %4 = vector.load %arg2[%c0_2, %c0_3, %c0_4] : memref<8x8x32xf32, #tpu.memory_space<vmem>>, vector<8x8x32xf32>
    %cst = arith.constant dense<0.000000e+00> : vector<8x32xf32>
    %5 = vector.multi_reduction <add>, %4, %cst [1] : vector<8x8x32xf32> to vector<8x32xf32>
    %6 = arith.addf %3, %5 : vector<8x32xf32>
    %c0_5 = arith.constant 0 : index
    %c0_6 = arith.constant 0 : index
    %7 = vector.load %arg6[%c0_5, %c0_6] : memref<8x32xf32, #tpu.memory_space<vmem>>, vector<8x32xf32>
    tpu.vector_store %arg6[%c0_5, %c0_6], %6 {strides = array<i32>} : memref<8x32xf32, #tpu.memory_space<vmem>>, vector<8x32xf32>,
    %c0_i32_7 = arith.constant 0 : i32
    %8 = arith.cmpi eq, %arg1, %c0_i32_7 : i32
    %9 = arith.extui %8 : i1 to i32
    %c0_i32_8 = arith.constant 0 : i32
    %10 = arith.cmpi ne, %9, %c0_i32_8 : i32
    scf.if %10 {
      %c0_9 = arith.constant 0 : index
      %c0_10 = arith.constant 0 : index
      %11 = vector.load %arg6[%c0_9, %c0_10] : memref<8x32xf32, #tpu.memory_space<vmem>>, vector<8x32xf32>
      %cst_11 = arith.constant 1.250000e-01 : f32
      %12 = vector.broadcast %cst_11 : f32 to vector<8x32xf32>
      %13 = arith.mulf %11, %12 : vector<8x32xf32>
      %c0_12 = arith.constant 0 : index
      %c0_13 = arith.constant 0 : index
      %14 = vector.load %arg3[%c0_12, %c0_13] : memref<32x128xf32, #tpu.memory_space<vmem>>, vector<32x128xf32>
      %cst_14 = arith.constant dense<0.000000e+00> : vector<8x128xf32>
      %15 = tpu.matmul %13, %14, %cst_14 {dimension_numbers = #tpu.dot_dimension_numbers<[1], [0], [0], [1], [0, 0, 1, 1], [], []>} : vector<8x32xf32>, vector<32x128xf32>, vector<8x128xf32> -> vector<8x128xf32>
      %c0_15 = arith.constant 0 : index
      %c0_16 = arith.constant 0 : index
      %16 = vector.load %arg4[%c0_15, %c0_16] : memref<1x128xf32, #tpu.memory_space<vmem>>, vector<1x128xf32>
      %17 = vector.broadcast %16 : vector<1x128xf32> to vector<8x128xf32>
      %18 = arith.addf %15, %17 : vector<8x128xf32>
      %c0_17 = arith.constant 0 : index
      %c0_18 = arith.constant 0 : index
      %19 = vector.load %arg5[%c0_17, %c0_18] : memref<8x128xf32, #tpu.memory_space<vmem>>, vector<8x128xf32>
      tpu.vector_store %arg5[%c0_17, %c0_18], %18 {strides = array<i32>} : memref<8x128xf32, #tpu.memory_space<vmem>>, vector<8x128xf32>,
    } else {
    }
    return
  }
  func.func @transform_0(%arg0: i32, %arg1: i32) -> (i32, i32, i32) {
    %c0_i32 = arith.constant 0 : i32
    %c0_i32_0 = arith.constant 0 : i32
    return %arg0, %arg1, %c0_i32 : i32, i32, i32
  }
  func.func @transform_1(%arg0: i32, %arg1: i32) -> (i32, i32) {
    %c0_i32 = arith.constant 0 : i32
    %c0_i32_0 = arith.constant 0 : i32
    %c0_i32_1 = arith.constant 0 : i32
    return %c0_i32, %c0_i32_0 : i32, i32
  }
  func.func @transform_2(%arg0: i32, %arg1: i32) -> (i32, i32) {
    %c0_i32 = arith.constant 0 : i32
    %c0_i32_0 = arith.constant 0 : i32
    %c0_i32_1 = arith.constant 0 : i32
    return %c0_i32, %c0_i32_0 : i32, i32
  }
  func.func @transform_3(%arg0: i32, %arg1: i32) -> (i32, i32) {
    %c0_i32 = arith.constant 0 : i32
    %c0_i32_0 = arith.constant 0 : i32
    return %arg0, %c0_i32 : i32, i32
  }
}

module attributes {stable_mosaic.version = 11 : i64} {
  func.func @_classifier_head_kernel(%arg0: i32, %arg1: i32, %arg2: memref<8x8x32xf32, #tpu.memory_space<vmem>>, %arg3: memref<32x128xf32, #tpu.memory_space<vmem>>, %arg4: memref<1x128xf32, #tpu.memory_space<vmem>>, %arg5: memref<8x128xf32, #tpu.memory_space<vmem>>, %arg6: memref<8x32xf32, #tpu.memory_space<vmem>>) attributes {dimension_semantics = [#tpu.dimension_semantics<parallel>, #tpu.dimension_semantics<arbitrary>], iteration_bounds = array<i64: 1, 1>, scalar_prefetch = 0 : i64, scratch_operands = 1 : i64, tpu.core_type = #tpu.core_type<tc>, window_params = [{transform_indices = @transform_0, window_bounds = array<i64: 8, 8, 32>}, {pipeline_mode = #tpu.pipeline_mode<synchronous>, transform_indices = @transform_1, window_bounds = array<i64: 32, 128>}, {pipeline_mode = #tpu.pipeline_mode<synchronous>, transform_indices = @transform_2, window_bounds = array<i64: 1, 128>}, {transform_indices = @transform_3, window_bounds = array<i64: 8, 128>}]} {
    %c0_i32 = arith.constant 0 : i32
    %0 = arith.cmpi eq, %arg1, %c0_i32 : i32
    %1 = arith.extui %0 : i1 to i32
    %c0_i32_0 = arith.constant 0 : i32
    %2 = arith.cmpi ne, %1, %c0_i32_0 : i32
    scf.if %2 {
      %cst_9 = arith.constant 0.000000e+00 : f32
      %11 = vector.broadcast %cst_9 : f32 to vector<8x32xf32>
      %c0_10 = arith.constant 0 : index
      %c0_11 = arith.constant 0 : index
      %12 = vector.load %arg6[%c0_10, %c0_11] : memref<8x32xf32, #tpu.memory_space<vmem>>, vector<8x32xf32>
      tpu.vector_store %arg6[%c0_10, %c0_11], %11 {strides = array<i32>} : memref<8x32xf32, #tpu.memory_space<vmem>>, vector<8x32xf32>,
    } else {
    }
    %c0 = arith.constant 0 : index
    %c0_1 = arith.constant 0 : index
    %3 = vector.load %arg6[%c0, %c0_1] : memref<8x32xf32, #tpu.memory_space<vmem>>, vector<8x32xf32>
    %c0_2 = arith.constant 0 : index
    %c0_3 = arith.constant 0 : index
    %c0_4 = arith.constant 0 : index
    %4 = vector.load %arg2[%c0_2, %c0_3, %c0_4] : memref<8x8x32xf32, #tpu.memory_space<vmem>>, vector<8x8x32xf32>
    %cst = arith.constant dense<0.000000e+00> : vector<8x32xf32>
    %5 = vector.multi_reduction <add>, %4, %cst [1] : vector<8x8x32xf32> to vector<8x32xf32>
    %6 = arith.addf %3, %5 : vector<8x32xf32>
    %c0_5 = arith.constant 0 : index
    %c0_6 = arith.constant 0 : index
    %7 = vector.load %arg6[%c0_5, %c0_6] : memref<8x32xf32, #tpu.memory_space<vmem>>, vector<8x32xf32>
    tpu.vector_store %arg6[%c0_5, %c0_6], %6 {strides = array<i32>} : memref<8x32xf32, #tpu.memory_space<vmem>>, vector<8x32xf32>,
    %c0_i32_7 = arith.constant 0 : i32
    %8 = arith.cmpi eq, %arg1, %c0_i32_7 : i32
    %9 = arith.extui %8 : i1 to i32
    %c0_i32_8 = arith.constant 0 : i32
    %10 = arith.cmpi ne, %9, %c0_i32_8 : i32
    scf.if %10 {
      %c0_9 = arith.constant 0 : index
      %c0_10 = arith.constant 0 : index
      %11 = vector.load %arg6[%c0_9, %c0_10] : memref<8x32xf32, #tpu.memory_space<vmem>>, vector<8x32xf32>
      %cst_11 = arith.constant 1.250000e-01 : f32
      %12 = vector.broadcast %cst_11 : f32 to vector<8x32xf32>
      %13 = arith.mulf %11, %12 : vector<8x32xf32>
      %c0_12 = arith.constant 0 : index
      %c0_13 = arith.constant 0 : index
      %14 = vector.load %arg3[%c0_12, %c0_13] : memref<32x128xf32, #tpu.memory_space<vmem>>, vector<32x128xf32>
      %cst_14 = arith.constant dense<0.000000e+00> : vector<8x128xf32>
      %15 = tpu.matmul %13, %14, %cst_14 {dimension_numbers = #tpu.dot_dimension_numbers<[1], [0], [0], [1], [0, 0, 1, 1], [], []>} : vector<8x32xf32>, vector<32x128xf32>, vector<8x128xf32> -> vector<8x128xf32>
      %c0_15 = arith.constant 0 : index
      %c0_16 = arith.constant 0 : index
      %16 = vector.load %arg4[%c0_15, %c0_16] : memref<1x128xf32, #tpu.memory_space<vmem>>, vector<1x128xf32>
      %17 = vector.broadcast %16 : vector<1x128xf32> to vector<8x128xf32>
      %18 = arith.addf %15, %17 : vector<8x128xf32>
      %c0_17 = arith.constant 0 : index
      %c0_18 = arith.constant 0 : index
      %19 = vector.load %arg5[%c0_17, %c0_18] : memref<8x128xf32, #tpu.memory_space<vmem>>, vector<8x128xf32>
      tpu.vector_store %arg5[%c0_17, %c0_18], %18 {strides = array<i32>} : memref<8x128xf32, #tpu.memory_space<vmem>>, vector<8x128xf32>,
    } else {
    }
    return
  }
  func.func @transform_0(%arg0: i32, %arg1: i32) -> (i32, i32, i32) {
    %c0_i32 = arith.constant 0 : i32
    %c0_i32_0 = arith.constant 0 : i32
    return %arg0, %arg1, %c0_i32 : i32, i32, i32
  }
  func.func @transform_1(%arg0: i32, %arg1: i32) -> (i32, i32) {
    %c0_i32 = arith.constant 0 : i32
    %c0_i32_0 = arith.constant 0 : i32
    %c0_i32_1 = arith.constant 0 : i32
    return %c0_i32, %c0_i32_0 : i32, i32
  }
  func.func @transform_2(%arg0: i32, %arg1: i32) -> (i32, i32) {
    %c0_i32 = arith.constant 0 : i32
    %c0_i32_0 = arith.constant 0 : i32
    %c0_i32_1 = arith.constant 0 : i32
    return %c0_i32, %c0_i32_0 : i32, i32
  }
  func.func @transform_3(%arg0: i32, %arg1: i32) -> (i32, i32) {
    %c0_i32 = arith.constant 0 : i32
    %c0_i32_0 = arith.constant 0 : i32
    return %arg0, %c0_i32 : i32, i32
  }
}

</mosaic_0001>

<bundles_post_ra>
// kernel: tpu_custom_call.1
= control target key start
LH: loop header
LB: loop body
LE: loop exit
PB: predicated region body
PF: predicated region fallthrough
CT: control target
= control target key end

     0   :  { %8 = vsyncpa [#allocation4], 0  ;;  %s430_s0 = inlined_call_operand.hbm [shape: f32[2,8,32], index: 0, kind: input, shape index: {}]   ;;  %s431_s1 = inlined_call_operand.hbm [shape: f32[32,128], index: 1, kind: input, shape index: {}]   ;;  %s432_s2 = inlined_call_operand.vmem [shape: f32[1,128], index: 2, kind: input, shape index: {}]   ;;  %s433_s3 = inlined_call_operand.hbm [shape: f32[8,128], index: 3, kind: output, shape index: {}]  }
   0x1   :  { %9 = vsyncpa [#allocation7], 0 }
   0x2   :  { %10 = vsyncpa [#allocation5], 0 }
   0x3   :  { %15 = vsyncadd [#allocation4], 768  ;;  %s350_s12 = smov [#allocation3]   ;;  %s278_s16 = scalar_lea.hbm %s430_s0, 256 }
   0x4   :  { %s16_s13 = sshll.u32 %s350_s12, 4  ;;  %p279_p0 = scmp.ne.s32.totalorder %s430_s0, %s278_s16  ;;  %s17_s13 = int_to_ptr.vmem [resolvable:$true] %s16_s13 }
   0x5   :  { %p282_p1 = scmp.lt.u32.totalorder %s278_s16, %s430_s0 }
   0x7   :  { %p284_p2 = pnand %p282_p1, %p279_p0 }
   0x9   :  { %287 = shalt.err (!%p284_p2)
}
   0xa   :  { %s288_s21 = scalar_lea.vmem %s17_s13, 256  ;;  %s292_s22 = scalar_lea.vmem %s17_s13, 1024 }
   0xb   :  { %p289_p3 = scmp.ne.s32.totalorder %s17_s13, %s288_s21  ;;  %p293_p4 = scmp.lt.s32.totalorder %s17_s13, %s17_s13 }
   0xc   :  { %p294_p5 = scmp.lt.s32.totalorder %s292_s22, %s288_s21 }
   0xe   :  { %p295_p6 = por %p294_p5, %p293_p4 }
  0x10   :  { %p296_p7 = pnand %p295_p6, %p289_p3 }
  0x12   :  { %299 = shalt.err (!%p296_p7)
}
  0x13   :  { %s351_s23 = smov 128   ;;  %s352_s24 = smov 8  }
  0x14   :  { %22 = dma.hbm_to_vmem [thread:$0]  %s430_s0, 256, %s17_s13, [#allocation4], %s351_s23, %s351_s23, %s352_s24  }
  0x15   :  { %s353_s27 = smov [#allocation6]   ;;  %s300_s4 = scalar_lea.hbm %s431_s1, 512 }
  0x16   :  { %s28_s28 = sshll.u32 %s353_s27, 4  ;;  %p301_p8 = scmp.ne.s32.totalorder %s431_s1, %s300_s4  ;;  %s29_s28 = int_to_ptr.vmem [resolvable:$true] %s28_s28 }
  0x17   :  { %p304_p9 = scmp.lt.u32.totalorder %s300_s4, %s431_s1 }
  0x19   :  { %p306_p10 = pnand %p304_p9, %p301_p8 }
  0x1b   :  { %309 = shalt.err (!%p306_p10)
}
  0x1c   :  { %s310_s9 = scalar_lea.vmem %s29_s28, 512  ;;  %p315_p12 = scmp.lt.s32.totalorder %s29_s28, %s29_s28 }
  0x1d   :  { %p311_p11 = scmp.ne.s32.totalorder %s29_s28, %s310_s9  ;;  %p316_p13 = scmp.lt.s32.totalorder %s310_s9, %s310_s9 }
  0x1f   :  { %p317_p0 = por %p316_p13, %p315_p12 }
  0x21   :  { %p318_p1 = pnand %p317_p0, %p311_p11 }
  0x23   :  { %321 = shalt.err (!%p318_p1)
}
  0x24   :  { %34 = dma.hbm_to_vmem [thread:$0]  %s431_s1, 512, %s29_s28, [#allocation7], %s351_s23, %s351_s23, %s352_s24  }
  0x25   :  { %344 = dma.done.wait [#allocation4], 1024  }
  0x26   :  { %345 = vsyncadd [#allocation4], 4294966272 }
  0x27   :  { %346 = dma.done.wait [#allocation7], 512  }
  0x28   :  { %347 = vsyncadd [#allocation7], 4294966784  ;;  %vm47_vm0 = vcmask 261120   ;;  %v354_v0 = vmov 0.0|0.0   ;;  %v355_v1 = vmov 0.0   ;;  %vm356_vm1 = vmmov 0  }
  0x29   :  { %264 = vmatprep.subr.bf16.mxu0 %v354_v0  ;;  %48 = vst.msk [vmem:[#allocation2] sm:$0xff] %vm47_vm0, %v355_v1  ;;  %261 = vmatprep.mubr.msk.f32.mxu0 %vm356_vm1, %v355_v1  ;;  %v145_v2 = vld [vmem:[#allocation6] sm:$0xff]  ;;  %v146_v3 = vld [vmem:[#allocation6 + $0x8] sm:$0xff]  ;;  %v147_v4 = vld [vmem:[#allocation6 + $0x10] sm:$0xff]  ;;  %vm123_vm2 = vcmask 1041409   ;;  %vm125_vm3 = vcmask 1042434  }
  0x2a   :  { %v265_v5 = vpack.c.bf16 %v146_v3, %v145_v2  ;;  %v148_v6 = vld [vmem:[#allocation6 + $0x18] sm:$0xff]  ;;  %v50_v7 = vld [vmem:[#allocation3] sm:$0xff]  ;;  %v51_v8 = vld [vmem:[#allocation3 + $0x8] sm:$0xff]  ;;  %vm127_vm4 = vcmask 1043459   ;;  %vm129_vm5 = vcmask 1044484   ;;  %vm131_vm6 = vcmask 1045509  }
  0x2b   :  { %v52_v9 = vld [vmem:[#allocation3 + $0x10] sm:$0xff]  ;;  %v53_v10 = vld [vmem:[#allocation3 + $0x18] sm:$0xff]  ;;  %v59_v11 = vsel %vm47_vm0, %v50_v7, 0.0  ;;  %v268_v12 = vpack.c.bf16 %v148_v6, %v147_v4  ;;  %v54_v13 = vld [vmem:[#allocation3 + $0x20] sm:$0xff]  ;;  %v66_v17 = vsel %vm47_vm0, %v51_v8, 0.0  ;;  %vm133_vm7 = vcmask 1046534  }
  0x2c   :  { %266 = vmatpush3.bf16.msra.mxu0 %v265_v5  ;;  %v55_v14 = vld [vmem:[#allocation3 + $0x28] sm:$0xff]  ;;  %v56_v15 = vld [vmem:[#allocation3 + $0x30] sm:$0xff]  ;;  %v60_v16 = vrot.slane %v59_v11, 4  ;;  %v73_v18 = vsel %vm47_vm0, %v52_v9, 0.0  ;;  %v67_v19 = vrot.slane %v66_v17, 4  ;;  %v80_v21 = vsel %vm47_vm0, %v53_v10, 0.0 }
  0x2d   :  { %267 = vmatprep.subr.bf16.mxu0 %v354_v0  ;;  %v74_v20 = vrot.slane %v73_v18, 4  ;;  %v87_v22 = vsel %vm47_vm0, %v54_v13, 0.0  ;;  %v57_v23 = vld [vmem:[#allocation3 + $0x38] sm:$0xff]  ;;  %v81_v25 = vrot.slane %v80_v21, 4  ;;  %v94_v27 = vsel %vm47_vm0, %v55_v14, 0.0  ;;  %s357_s12 = smov [#allocation8]  }
  0x2e   :  { %v61_v24 = vadd.f32 %v60_v16, %v59_v11  ;;  %v88_v26 = vrot.slane %v87_v22, 4  ;;  %v68_v28 = vadd.f32 %v67_v19, %v66_v17  ;;  %v95_v30 = vrot.slane %v94_v27, 4  ;;  %v246_v19 = vld [vmem:[%s432_s2] ss:$0 sm:$0xff]  ;;  %s236_s13 = sshll.u32 %s357_s12, 4  ;;  %s237_s13 = int_to_ptr.vmem [resolvable:$true] %s236_s13 }
  0x2f   :  { %v75_v29 = vadd.f32 %v74_v20, %v73_v18  ;;  %v101_v31 = vsel %vm47_vm0, %v56_v15, 0.0  ;;  %v82_v33 = vadd.f32 %v81_v25, %v80_v21  ;;  %v108_v39 = vsel %vm47_vm0, %v57_v23, 0.0  ;;  %s322_s14 = scalar_lea.vmem %s237_s13, 128  ;;  %p327_p3 = scmp.lt.s32.totalorder %s237_s13, %s237_s13 }
  0x30   :  { %269 = vmatpush3.bf16.msra.mxu0 %v268_v12  ;;  %v62_v32 = vrot.slane %v61_v24, 2  ;;  %v89_v34 = vadd.f32 %v88_v26, %v87_v22  ;;  %v102_v35 = vrot.slane %v101_v31, 4  ;;  %v69_v36 = vrot.slane %v68_v28, 2  ;;  %v49_v11 = vld [vmem:[#allocation2] sm:$0xff]  ;;  %p323_p2 = scmp.ne.s32.totalorder %s237_s13, %s322_s14  ;;  %p328_p4 = scmp.lt.s32.totalorder %s322_s14, %s322_s14 }
  0x31   :  { %v76_v37 = vrot.slane %v75_v29, 2  ;;  %v96_v38 = vadd.f32 %v95_v30, %v94_v27  ;;  %v83_v41 = vrot.slane %v82_v33, 2  ;;  %v109_v47 = vrot.slane %v108_v39, 4 }
  0x32   :  { %v63_v40 = vadd.f32 %v62_v32, %v61_v24  ;;  %v90_v42 = vrot.slane %v89_v34, 2  ;;  %v103_v43 = vadd.f32 %v102_v35, %v101_v31  ;;  %v70_v44 = vadd.f32 %v69_v36, %v68_v28  ;;  %p329_p5 = por %p328_p4, %p327_p3 }
  0x33   :  { %v77_v45 = vadd.f32 %v76_v37, %v75_v29  ;;  %v97_v46 = vrot.slane %v96_v38, 2  ;;  %v84_v49 = vadd.f32 %v83_v41, %v82_v33  ;;  %v110_v55 = vadd.f32 %v109_v47, %v108_v39 }
  0x34   :  { %v64_v48 = vrot.slane %v63_v40, 1  ;;  %v91_v50 = vadd.f32 %v90_v42, %v89_v34  ;;  %v104_v51 = vrot.slane %v103_v43, 2  ;;  %v71_v52 = vrot.slane %v70_v44, 1  ;;  %p330_p6 = pnand %p329_p5, %p323_p2 }
  0x35   :  { %v78_v53 = vrot.slane %v77_v45, 1  ;;  %v98_v54 = vadd.f32 %v97_v46, %v96_v38  ;;  %v85_v57 = vrot.slane %v84_v49, 1  ;;  %v111_v63 = vrot.slane %v110_v55, 2 }
  0x36   :  { %v65_v56 = vadd.f32 %v64_v48, %v63_v40  ;;  %v92_v58 = vrot.slane %v91_v50, 1  ;;  %v105_v59 = vadd.f32 %v104_v51, %v103_v43  ;;  %v72_v60 = vadd.f32 %v71_v52, %v70_v44 }
  0x37   :  { %v79_v61 = vadd.f32 %v78_v53, %v77_v45  ;;  %v99_v62 = vrot.slane %v98_v54, 1  ;;  %v86_v0 = vadd.f32 %v85_v57, %v84_v49  ;;  %v112_v4 = vadd.f32 %v111_v63, %v110_v55 }
  0x38   :  { %v93_v1 = vadd.f32 %v92_v58, %v91_v50  ;;  %v106_v2 = vrot.slane %v105_v59, 1  ;;  %v124_v5 = vsel %vm123_vm2, %v72_v60, %v65_v56  ;;  %vm135_vm8 = vcmask 1047559  }
  0x39   :  { %v100_v3 = vadd.f32 %v99_v62, %v98_v54  ;;  %v126_v7 = vsel %vm125_vm3, %v79_v61, %v124_v5  ;;  %v113_v8 = vrot.slane %v112_v4, 1 }
  0x3a   :  { %v107_v6 = vadd.f32 %v106_v2, %v105_v59  ;;  %v128_v9 = vsel %vm127_vm4, %v86_v0, %v126_v7 }
  0x3b   :  { %v130_v10 = vsel %vm129_vm5, %v93_v1, %v128_v9  ;;  %v114_v12 = vadd.f32 %v113_v8, %v112_v4 }
  0x3c   :  { %v132_v13 = vsel %vm131_vm6, %v100_v3, %v130_v10 }
  0x3d   :  { %v134_v14 = vsel %vm133_vm7, %v107_v6, %v132_v13 }
  0x3e   :  { %v136_v15 = vsel %vm135_vm8, %v114_v12, %v134_v14 }
  0x3f   :  { %v138_v16 = vadd.f32 %v136_v15, %v49_v11 }
  0x41   :  { %139 = vst.msk [vmem:[#allocation2] sm:$0xff] %vm47_vm0, %v138_v16 }
  0x48   :  { %v143_v17 = vld [vmem:[#allocation2] sm:$0xff] }
  0x49   :  { %v144_v18 = vmul.f32 0.125, %v143_v17 }
  0x4b   :  { %262 = vmatmul.mubr.msk.f32.vlgmr.msra.gmra.mrb[0].mxu0 %vm47_vm0, %v144_v18 }
 0x11e   :  { %v225_v20 = vpop.f32.mrb[0].mxu0 }
 0x11f   :  { %v226_v21 = vadd.f32 %v246_v19, %v225_v20  ;;  %v263_v22 = vpop.f32.mrb[1].mxu0 }
 0x121   :  { %229 = vst [vmem:[#allocation8] sm:$0xff] %v226_v21 }
 0x122   :  { %333 = shalt.err (!%p330_p6)
}
 0x123   :  { %s334_s17 = scalar_lea.hbm %s433_s3, 128 }
 0x124   :  { %p335_p7 = scmp.ne.s32.totalorder %s433_s3, %s334_s17  ;;  %p338_p8 = scmp.lt.u32.totalorder %s334_s17, %s433_s3 }
 0x126   :  { %p340_p9 = pnand %p338_p8, %p335_p7 }
 0x128   :  { %343 = shalt.err (!%p340_p9)
}
 0x129   :  { %239 = dma.vmem_to_hbm [thread:$0]  %s237_s13, 128, %s433_s3, [#allocation5]  }
 0x12a   :  { %348 = dma.done.wait [#allocation5], 128  }
 0x12b   :  { %349 = vsyncadd [#allocation5], 4294967168 }
 0x12c   :  { %243 = vsyncpa [#allocation4], 1 }
 0x12d   :  { %244 = vsyncpa [#allocation7], 1 }
 0x12e   :  { %245 = vsyncpa [#allocation5], 1 }

// kernel: tpu_custom_call.1
= control target key start
LH: loop header
LB: loop body
LE: loop exit
PB: predicated region body
PF: predicated region fallthrough
CT: control target
= control target key end

     0   :  { %8 = vsyncpa [#allocation4], 0  ;;  %s430_s0 = inlined_call_operand.hbm [shape: f32[2,8,32], index: 0, kind: input, shape index: {}]   ;;  %s431_s1 = inlined_call_operand.hbm [shape: f32[32,128], index: 1, kind: input, shape index: {}]   ;;  %s432_s2 = inlined_call_operand.vmem [shape: f32[1,128], index: 2, kind: input, shape index: {}]   ;;  %s433_s3 = inlined_call_operand.hbm [shape: f32[8,128], index: 3, kind: output, shape index: {}]  }
   0x1   :  { %9 = vsyncpa [#allocation7], 0 }
   0x2   :  { %10 = vsyncpa [#allocation5], 0 }
   0x3   :  { %15 = vsyncadd [#allocation4], 768  ;;  %s350_s12 = smov [#allocation3]   ;;  %s278_s16 = scalar_lea.hbm %s430_s0, 256 }
   0x4   :  { %s16_s13 = sshll.u32 %s350_s12, 4  ;;  %p279_p0 = scmp.ne.s32.totalorder %s430_s0, %s278_s16  ;;  %s17_s13 = int_to_ptr.vmem [resolvable:$true] %s16_s13 }
   0x5   :  { %p282_p1 = scmp.lt.u32.totalorder %s278_s16, %s430_s0 }
   0x7   :  { %p284_p2 = pnand %p282_p1, %p279_p0 }
   0x9   :  { %287 = shalt.err (!%p284_p2)
}
   0xa   :  { %s288_s21 = scalar_lea.vmem %s17_s13, 256  ;;  %s292_s22 = scalar_lea.vmem %s17_s13, 1024 }
   0xb   :  { %p289_p3 = scmp.ne.s32.totalorder %s17_s13, %s288_s21  ;;  %p293_p4 = scmp.lt.s32.totalorder %s17_s13, %s17_s13 }
   0xc   :  { %p294_p5 = scmp.lt.s32.totalorder %s292_s22, %s288_s21 }
   0xe   :  { %p295_p6 = por %p294_p5, %p293_p4 }
  0x10   :  { %p296_p7 = pnand %p295_p6, %p289_p3 }
  0x12   :  { %299 = shalt.err (!%p296_p7)
}
  0x13   :  { %s351_s23 = smov 128   ;;  %s352_s24 = smov 8  }
  0x14   :  { %22 = dma.hbm_to_vmem [thread:$0]  %s430_s0, 256, %s17_s13, [#allocation4], %s351_s23, %s351_s23, %s352_s24  }
  0x15   :  { %s353_s27 = smov [#allocation6]   ;;  %s300_s4 = scalar_lea.hbm %s431_s1, 512 }
  0x16   :  { %s28_s28 = sshll.u32 %s353_s27, 4  ;;  %p301_p8 = scmp.ne.s32.totalorder %s431_s1, %s300_s4  ;;  %s29_s28 = int_to_ptr.vmem [resolvable:$true] %s28_s28 }
  0x17   :  { %p304_p9 = scmp.lt.u32.totalorder %s300_s4, %s431_s1 }
  0x19   :  { %p306_p10 = pnand %p304_p9, %p301_p8 }
  0x1b   :  { %309 = shalt.err (!%p306_p10)
}
  0x1c   :  { %s310_s9 = scalar_lea.vmem %s29_s28, 512  ;;  %p315_p12 = scmp.lt.s32.totalorder %s29_s28, %s29_s28 }
  0x1d   :  { %p311_p11 = scmp.ne.s32.totalorder %s29_s28, %s310_s9  ;;  %p316_p13 = scmp.lt.s32.totalorder %s310_s9, %s310_s9 }
  0x1f   :  { %p317_p0 = por %p316_p13, %p315_p12 }
  0x21   :  { %p318_p1 = pnand %p317_p0, %p311_p11 }
  0x23   :  { %321 = shalt.err (!%p318_p1)
}
  0x24   :  { %34 = dma.hbm_to_vmem [thread:$0]  %s431_s1, 512, %s29_s28, [#allocation7], %s351_s23, %s351_s23, %s352_s24  }
  0x25   :  { %344 = dma.done.wait [#allocation4], 1024  }
  0x26   :  { %345 = vsyncadd [#allocation4], 4294966272 }
  0x27   :  { %346 = dma.done.wait [#allocation7], 512  }
  0x28   :  { %347 = vsyncadd [#allocation7], 4294966784  ;;  %vm47_vm0 = vcmask 261120   ;;  %v354_v0 = vmov 0.0|0.0   ;;  %v355_v1 = vmov 0.0   ;;  %vm356_vm1 = vmmov 0  }
  0x29   :  { %264 = vmatprep.subr.bf16.mxu0 %v354_v0  ;;  %48 = vst.msk [vmem:[#allocation2] sm:$0xff] %vm47_vm0, %v355_v1  ;;  %261 = vmatprep.mubr.msk.f32.mxu0 %vm356_vm1, %v355_v1  ;;  %v145_v2 = vld [vmem:[#allocation6] sm:$0xff]  ;;  %v146_v3 = vld [vmem:[#allocation6 + $0x8] sm:$0xff]  ;;  %v147_v4 = vld [vmem:[#allocation6 + $0x10] sm:$0xff]  ;;  %vm123_vm2 = vcmask 1041409   ;;  %vm125_vm3 = vcmask 1042434  }
  0x2a   :  { %v265_v5 = vpack.c.bf16 %v146_v3, %v145_v2  ;;  %v148_v6 = vld [vmem:[#allocation6 + $0x18] sm:$0xff]  ;;  %v50_v7 = vld [vmem:[#allocation3] sm:$0xff]  ;;  %v51_v8 = vld [vmem:[#allocation3 + $0x8] sm:$0xff]  ;;  %vm127_vm4 = vcmask 1043459   ;;  %vm129_vm5 = vcmask 1044484   ;;  %vm131_vm6 = vcmask 1045509  }
  0x2b   :  { %v52_v9 = vld [vmem:[#allocation3 + $0x10] sm:$0xff]  ;;  %v53_v10 = vld [vmem:[#allocation3 + $0x18] sm:$0xff]  ;;  %v59_v11 = vsel %vm47_vm0, %v50_v7, 0.0  ;;  %v268_v12 = vpack.c.bf16 %v148_v6, %v147_v4  ;;  %v54_v13 = vld [vmem:[#allocation3 + $0x20] sm:$0xff]  ;;  %v66_v17 = vsel %vm47_vm0, %v51_v8, 0.0  ;;  %vm133_vm7 = vcmask 1046534  }
  0x2c   :  { %266 = vmatpush3.bf16.msra.mxu0 %v265_v5  ;;  %v55_v14 = vld [vmem:[#allocation3 + $0x28] sm:$0xff]  ;;  %v56_v15 = vld [vmem:[#allocation3 + $0x30] sm:$0xff]  ;;  %v60_v16 = vrot.slane %v59_v11, 4  ;;  %v73_v18 = vsel %vm47_vm0, %v52_v9, 0.0  ;;  %v67_v19 = vrot.slane %v66_v17, 4  ;;  %v80_v21 = vsel %vm47_vm0, %v53_v10, 0.0 }
  0x2d   :  { %267 = vmatprep.subr.bf16.mxu0 %v354_v0  ;;  %v74_v20 = vrot.slane %v73_v18, 4  ;;  %v87_v22 = vsel %vm47_vm0, %v54_v13, 0.0  ;;  %v57_v23 = vld [vmem:[#allocation3 + $0x38] sm:$0xff]  ;;  %v81_v25 = vrot.slane %v80_v21, 4  ;;  %v94_v27 = vsel %vm47_vm0, %v55_v14, 0.0  ;;  %s357_s12 = smov [#allocation8]  }
  0x2e   :  { %v61_v24 = vadd.f32 %v60_v16, %v59_v11  ;;  %v88_v26 = vrot.slane %v87_v22, 4  ;;  %v68_v28 = vadd.f32 %v67_v19, %v66_v17  ;;  %v95_v30 = vrot.slane %v94_v27, 4  ;;  %v246_v19 = vld [vmem:[%s432_s2] ss:$0 sm:$0xff]  ;;  %s236_s13 = sshll.u32 %s357_s12, 4  ;;  %s237_s13 = int_to_ptr.vmem [resolvable:$true] %s236_s13 }
  0x2f   :  { %v75_v29 = vadd.f32 %v74_v20, %v73_v18  ;;  %v101_v31 = vsel %vm47_vm0, %v56_v15, 0.0  ;;  %v82_v33 = vadd.f32 %v81_v25, %v80_v21  ;;  %v108_v39 = vsel %vm47_vm0, %v57_v23, 0.0  ;;  %s322_s14 = scalar_lea.vmem %s237_s13, 128  ;;  %p327_p3 = scmp.lt.s32.totalorder %s237_s13, %s237_s13 }
  0x30   :  { %269 = vmatpush3.bf16.msra.mxu0 %v268_v12  ;;  %v62_v32 = vrot.slane %v61_v24, 2  ;;  %v89_v34 = vadd.f32 %v88_v26, %v87_v22  ;;  %v102_v35 = vrot.slane %v101_v31, 4  ;;  %v69_v36 = vrot.slane %v68_v28, 2  ;;  %v49_v11 = vld [vmem:[#allocation2] sm:$0xff]  ;;  %p323_p2 = scmp.ne.s32.totalorder %s237_s13, %s322_s14  ;;  %p328_p4 = scmp.lt.s32.totalorder %s322_s14, %s322_s14 }
  0x31   :  { %v76_v37 = vrot.slane %v75_v29, 2  ;;  %v96_v38 = vadd.f32 %v95_v30, %v94_v27  ;;  %v83_v41 = vrot.slane %v82_v33, 2  ;;  %v109_v47 = vrot.slane %v108_v39, 4 }
  0x32   :  { %v63_v40 = vadd.f32 %v62_v32, %v61_v24  ;;  %v90_v42 = vrot.slane %v89_v34, 2  ;;  %v103_v43 = vadd.f32 %v102_v35, %v101_v31  ;;  %v70_v44 = vadd.f32 %v69_v36, %v68_v28  ;;  %p329_p5 = por %p328_p4, %p327_p3 }
  0x33   :  { %v77_v45 = vadd.f32 %v76_v37, %v75_v29  ;;  %v97_v46 = vrot.slane %v96_v38, 2  ;;  %v84_v49 = vadd.f32 %v83_v41, %v82_v33  ;;  %v110_v55 = vadd.f32 %v109_v47, %v108_v39 }
  0x34   :  { %v64_v48 = vrot.slane %v63_v40, 1  ;;  %v91_v50 = vadd.f32 %v90_v42, %v89_v34  ;;  %v104_v51 = vrot.slane %v103_v43, 2  ;;  %v71_v52 = vrot.slane %v70_v44, 1  ;;  %p330_p6 = pnand %p329_p5, %p323_p2 }
  0x35   :  { %v78_v53 = vrot.slane %v77_v45, 1  ;;  %v98_v54 = vadd.f32 %v97_v46, %v96_v38  ;;  %v85_v57 = vrot.slane %v84_v49, 1  ;;  %v111_v63 = vrot.slane %v110_v55, 2 }
  0x36   :  { %v65_v56 = vadd.f32 %v64_v48, %v63_v40  ;;  %v92_v58 = vrot.slane %v91_v50, 1  ;;  %v105_v59 = vadd.f32 %v104_v51, %v103_v43  ;;  %v72_v60 = vadd.f32 %v71_v52, %v70_v44 }
  0x37   :  { %v79_v61 = vadd.f32 %v78_v53, %v77_v45  ;;  %v99_v62 = vrot.slane %v98_v54, 1  ;;  %v86_v0 = vadd.f32 %v85_v57, %v84_v49  ;;  %v112_v4 = vadd.f32 %v111_v63, %v110_v55 }
  0x38   :  { %v93_v1 = vadd.f32 %v92_v58, %v91_v50  ;;  %v106_v2 = vrot.slane %v105_v59, 1  ;;  %v124_v5 = vsel %vm123_vm2, %v72_v60, %v65_v56  ;;  %vm135_vm8 = vcmask 1047559  }
  0x39   :  { %v100_v3 = vadd.f32 %v99_v62, %v98_v54  ;;  %v126_v7 = vsel %vm125_vm3, %v79_v61, %v124_v5  ;;  %v113_v8 = vrot.slane %v112_v4, 1 }
  0x3a   :  { %v107_v6 = vadd.f32 %v106_v2, %v105_v59  ;;  %v128_v9 = vsel %vm127_vm4, %v86_v0, %v126_v7 }
  0x3b   :  { %v130_v10 = vsel %vm129_vm5, %v93_v1, %v128_v9  ;;  %v114_v12 = vadd.f32 %v113_v8, %v112_v4 }
  0x3c   :  { %v132_v13 = vsel %vm131_vm6, %v100_v3, %v130_v10 }
  0x3d   :  { %v134_v14 = vsel %vm133_vm7, %v107_v6, %v132_v13 }
  0x3e   :  { %v136_v15 = vsel %vm135_vm8, %v114_v12, %v134_v14 }
  0x3f   :  { %v138_v16 = vadd.f32 %v136_v15, %v49_v11 }
  0x41   :  { %139 = vst.msk [vmem:[#allocation2] sm:$0xff] %vm47_vm0, %v138_v16 }
  0x48   :  { %v143_v17 = vld [vmem:[#allocation2] sm:$0xff] }
  0x49   :  { %v144_v18 = vmul.f32 0.125, %v143_v17 }
  0x4b   :  { %262 = vmatmul.mubr.msk.f32.vlgmr.msra.gmra.mrb[0].mxu0 %vm47_vm0, %v144_v18 }
 0x11e   :  { %v225_v20 = vpop.f32.mrb[0].mxu0 }
 0x11f   :  { %v226_v21 = vadd.f32 %v246_v19, %v225_v20  ;;  %v263_v22 = vpop.f32.mrb[1].mxu0 }
 0x121   :  { %229 = vst [vmem:[#allocation8] sm:$0xff] %v226_v21 }
 0x122   :  { %333 = shalt.err (!%p330_p6)
}
 0x123   :  { %s334_s17 = scalar_lea.hbm %s433_s3, 128 }
 0x124   :  { %p335_p7 = scmp.ne.s32.totalorder %s433_s3, %s334_s17  ;;  %p338_p8 = scmp.lt.u32.totalorder %s334_s17, %s433_s3 }
 0x126   :  { %p340_p9 = pnand %p338_p8, %p335_p7 }
 0x128   :  { %343 = shalt.err (!%p340_p9)
}
 0x129   :  { %239 = dma.vmem_to_hbm [thread:$0]  %s237_s13, 128, %s433_s3, [#allocation5]  }
 0x12a   :  { %348 = dma.done.wait [#allocation5], 128  }
 0x12b   :  { %349 = vsyncadd [#allocation5], 4294967168 }
 0x12c   :  { %243 = vsyncpa [#allocation4], 1 }
 0x12d   :  { %244 = vsyncpa [#allocation7], 1 }
 0x12e   :  { %245 = vsyncpa [#allocation5], 1 }

</bundles_post_ra>
